<compile_context>
chip_gen: v5e
topology: v5e:2x2
jax: 0.10.0
libtpu: 0.0.40
codegen_flags: <defaults>
</compile_context>

<pallas_src>
import functools
import math

import jax
import jax.numpy as jnp
from jax.experimental import pallas as pl
from jax.experimental.pallas import tpu as pltpu

NUM_POINT = 128      # config.num_point (lane-aligned)
NUM_CLASSES = 40     # config.num_classes ("output: B x 40")
OUT_PAD = 128        # logits padded to a full lane width inside the kernel
K_PAD = 8            # conv contraction dim padded 3 -> 8
BN_EPS = 1e-5
LEAKY_SLOPE = 0.01   # nn.LeakyReLU() default


def _round_up(x, m):
    return (x + m - 1) // m * m


def _leaky_relu(x):
    return jnp.where(x > 0, x, LEAKY_SLOPE * x)


def _pick_tb(batch):
    """Batch tile: >=2 grid steps (v7x megacore), >=4 for large B (DMA overlap)."""
    steps = 4 if batch >= 256 else 2
    return max(8, min(128, _round_up(pl.cdiv(batch, steps), 8)))


def pointnet_kernel(x_ref, wc_ref, bc_ref, w1_ref, b1_ref,
                    w2_ref, b2_ref, w3_ref, b3_ref, out_ref, feat_ref, *, tb):
    # x_ref: (tb, K_PAD, P) bf16, channel-major (torch's raw (B, 3, P) view),
    # lane-dense.  Weight refs are bf16 with BatchNorm folded in; biases f32.

    # --- fused 1x1 Conv2d(3 -> P) + max_pool over points -----------------------
    # Per batch: transpose the tiny (K_PAD, P) slab (f32 transpose for safety),
    # matmul against the (K_PAD, P) conv weight, and max-reduce over the point
    # (row) axis straight into the feature scratch.  The (tb*P, P) activation
    # never leaves registers, so nothing spills to VMEM.
    @pl.loop(0, tb)
    def _(b):
        xb = x_ref[b].astype(jnp.float32)             # (K_PAD, P)
        xbt = xb.T.astype(jnp.bfloat16)               # (P, K_PAD)
        y = jnp.dot(xbt, wc_ref[...],
                    preferred_element_type=jnp.float32)   # (P, P) f32
        feat_ref[pl.ds(b, 1), :] = jnp.max(y, axis=0, keepdims=True)

    # Conv bias (folded BN2d) + LeakyReLU hoisted past the max-pool: exact,
    # since LeakyReLU is monotone and the bias is constant over pooled points.
    h = _leaky_relu(feat_ref[...] + bc_ref[...])          # (tb, P)

    # fc1 + folded BatchNorm1d + LeakyReLU
    h = _leaky_relu(jnp.dot(h.astype(jnp.bfloat16), w1_ref[...],
                            preferred_element_type=jnp.float32) + b1_ref[...])
    # TODO(synk): F.dropout(p=0.2) defaults to training=True (stochastic) in the
    # reference; implemented as identity (inference mode).

    # fc2 + folded BatchNorm1d + LeakyReLU
    h = _leaky_relu(jnp.dot(h.astype(jnp.bfloat16), w2_ref[...],
                            preferred_element_type=jnp.float32) + b2_ref[...])

    # fc3 (output padded to 128 lanes for unmasked, lane-dense stores)
    out = jnp.dot(h.astype(jnp.bfloat16), w3_ref[...],
                  preferred_element_type=jnp.float32) + b3_ref[...]
    out_ref[...] = out.astype(out_ref.dtype)              # (tb, 128)


def init_params(key):
    """Deterministic params matching PointNet.initialize_weights(), with eval-mode
    BatchNorm (running_mean=0, running_var=1, gamma=1, beta=0) and biases folded
    directly into the weights."""
    P, C = NUM_POINT, NUM_CLASSES
    ks = jax.random.split(key, 4)
    bn_scale = 1.0 / math.sqrt(1.0 + BN_EPS)   # gamma / sqrt(running_var + eps)

    # Conv2d(3, P, 1x1): weight ~ N(0, sqrt(2 / (kh*kw*out))), bias = 0.
    wc = jax.random.normal(ks[0], (P, 3), jnp.float32) * math.sqrt(2.0 / (1 * 1 * P))
    wc_f = (wc * bn_scale).T                                 # fold BN2d, -> (3, P)
    wc_f = jnp.pad(wc_f, ((0, K_PAD - 3), (0, 0)))           # pad K: 3 -> 8
    bc_f = jnp.zeros((1, P), jnp.float32)                    # (bias - mean)*scale + beta

    # Linear layers: weight ~ N(0, 0.01), bias = 0; BN1d folded for fc1/fc2.
    w1 = jax.random.normal(ks[1], (512, P), jnp.float32) * 0.01
    w1_f = (w1 * bn_scale).T                                 # (P, 512)
    b1_f = jnp.zeros((1, 512), jnp.float32)

    w2 = jax.random.normal(ks[2], (256, 512), jnp.float32) * 0.01
    w2_f = (w2 * bn_scale).T                                 # (512, 256)
    b2_f = jnp.zeros((1, 256), jnp.float32)

    # fc3 has no BN; pad the output dim 40 -> 128 lanes.
    w3 = jax.random.normal(ks[3], (C, 256), jnp.float32) * 0.01
    w3_f = jnp.pad(w3.T, ((0, 0), (0, OUT_PAD - C)))         # (256, 128)
    b3_f = jnp.zeros((1, OUT_PAD), jnp.float32)

    return dict(
        wc=wc_f.astype(jnp.bfloat16), bc=bc_f,
        w1=w1_f.astype(jnp.bfloat16), b1=b1_f,
        w2=w2_f.astype(jnp.bfloat16), b2=b2_f,
        w3=w3_f.astype(jnp.bfloat16), b3=b3_f,
    )


def pointnet_forward(x, params):
    """x: (B, num_point, 3) float32 -> logits (B, num_classes) float32."""
    B, P = x.shape[0], NUM_POINT
    TB = _pick_tb(B)
    B_pad = _round_up(B, TB)

    # torch's raw row-major view (B, N, 3) -> (B, 3, P) needs no transpose; pad
    # channels 3 -> 8 and batch to the tile size; ship bf16 (halves the DMA).
    x_ckp = jnp.pad(x.reshape(B, 3, P).astype(jnp.bfloat16),
                    ((0, B_pad - B), (0, K_PAD - 3), (0, 0)))   # (B_pad, 8, P)

    grid = (B_pad // TB,)
    kernel = functools.partial(pointnet_kernel, tb=TB)

    def resident(i):                          # weights: same block every step
        return (0, 0)

    out = pl.pallas_call(
        kernel,
        out_shape=jax.ShapeDtypeStruct((B_pad, OUT_PAD), jnp.float32),
        grid=grid,
        in_specs=[
            pl.BlockSpec((TB, K_PAD, P), lambda i: (i, 0, 0)),   # x tile (pipelined)
            pl.BlockSpec(params["wc"].shape, resident),
            pl.BlockSpec(params["bc"].shape, resident),
            pl.BlockSpec(params["w1"].shape, resident),
            pl.BlockSpec(params["b1"].shape, resident),
            pl.BlockSpec(params["w2"].shape, resident),
            pl.BlockSpec(params["b2"].shape, resident),
            pl.BlockSpec(params["w3"].shape, resident),
            pl.BlockSpec(params["b3"].shape, resident),
        ],
        out_specs=pl.BlockSpec((TB, OUT_PAD), lambda i: (i, 0)),
        scratch_shapes=[pltpu.VMEM((TB, P), jnp.float32)],       # pooled features
        compiler_params=pltpu.CompilerParams(
            dimension_semantics=("parallel",),
            vmem_limit_bytes=16 << 20),
    )(x_ckp, params["wc"], params["bc"], params["w1"], params["b1"],
      params["w2"], params["b2"], params["w3"], params["b3"])

    return out[:B, :NUM_CLASSES]


def _reference_forward(x, params):
    """Pure-JAX mirror in the ORIGINAL op order (bias + LeakyReLU before the max)
    to validate the kernel's hoist/fusion; same dtype casts as the kernel."""
    B, P = x.shape[0], NUM_POINT
    xk = jnp.pad(x.reshape(B, 3, P).astype(jnp.bfloat16),
                 ((0, 0), (0, K_PAD - 3), (0, 0))).astype(jnp.float32)
    wc = params["wc"].astype(jnp.float32)
    y = jnp.einsum("bkp,kc->bpc", xk, wc,
                   precision=jax.lax.Precision.HIGHEST)          # (B, P, P)
    y = _leaky_relu(y + params["bc"])                            # original order
    feat = jnp.max(y, axis=1)                                    # (B, P)
    h = _leaky_relu(jnp.dot(feat.astype(jnp.bfloat16), params["w1"],
                            preferred_element_type=jnp.float32) + params["b1"])
    h = _leaky_relu(jnp.dot(h.astype(jnp.bfloat16), params["w2"],
                            preferred_element_type=jnp.float32) + params["b2"])
    out = jnp.dot(h.astype(jnp.bfloat16), params["w3"],
                  preferred_element_type=jnp.float32) + params["b3"]
    return out[:, :NUM_CLASSES]


if __name__ == "__main__":
    key = jax.random.PRNGKey(0)
    k_x, k_p = jax.random.split(key)

    B = 2
    x = jax.random.normal(k_x, (B, NUM_POINT, 3), dtype=jnp.float32)
    params = init_params(k_p)

    logits = jax.block_until_ready(pointnet_forward(x, params))
    assert logits.shape == (B, NUM_CLASSES), logits.shape
    assert bool(jnp.all(jnp.isfinite(logits)))

    ref = _reference_forward(x, params)
    assert jnp.allclose(logits, ref, rtol=1e-2, atol=1e-4), (
        float(jnp.max(jnp.abs(logits - ref))))

    print("KERNEL_OK")
</pallas_src>

<mosaic_0001>
module attributes {stable_mosaic.version = 11 : i64} {
  func.func @pointnet_kernel(%arg0: i32, %arg1: memref<8x8x128xbf16, #tpu.memory_space<vmem>>, %arg2: memref<8x128xbf16, #tpu.memory_space<vmem>>, %arg3: memref<1x128xf32, #tpu.memory_space<vmem>>, %arg4: memref<128x512xbf16, #tpu.memory_space<vmem>>, %arg5: memref<1x512xf32, #tpu.memory_space<vmem>>, %arg6: memref<512x256xbf16, #tpu.memory_space<vmem>>, %arg7: memref<1x256xf32, #tpu.memory_space<vmem>>, %arg8: memref<256x128xbf16, #tpu.memory_space<vmem>>, %arg9: memref<1x128xf32, #tpu.memory_space<vmem>>, %arg10: memref<8x128xf32, #tpu.memory_space<vmem>>, %arg11: memref<8x128xf32, #tpu.memory_space<vmem>>) attributes {dimension_semantics = [#tpu.dimension_semantics<parallel>], iteration_bounds = array<i64: 1>, scalar_prefetch = 0 : i64, scratch_operands = 1 : i64, tpu.core_type = #tpu.core_type<tc>, window_params = [{transform_indices = @transform_0, window_bounds = array<i64: 8, 8, 128>}, {pipeline_mode = #tpu.pipeline_mode<synchronous>, transform_indices = @transform_1, window_bounds = array<i64: 8, 128>}, {pipeline_mode = #tpu.pipeline_mode<synchronous>, transform_indices = @transform_2, window_bounds = array<i64: 1, 128>}, {pipeline_mode = #tpu.pipeline_mode<synchronous>, transform_indices = @transform_3, window_bounds = array<i64: 128, 512>}, {pipeline_mode = #tpu.pipeline_mode<synchronous>, transform_indices = @transform_4, window_bounds = array<i64: 1, 512>}, {pipeline_mode = #tpu.pipeline_mode<synchronous>, transform_indices = @transform_5, window_bounds = array<i64: 512, 256>}, {pipeline_mode = #tpu.pipeline_mode<synchronous>, transform_indices = @transform_6, window_bounds = array<i64: 1, 256>}, {pipeline_mode = #tpu.pipeline_mode<synchronous>, transform_indices = @transform_7, window_bounds = array<i64: 256, 128>}, {pipeline_mode = #tpu.pipeline_mode<synchronous>, transform_indices = @transform_8, window_bounds = array<i64: 1, 128>}, {transform_indices = @transform_9, window_bounds = array<i64: 8, 128>}]} {
    %c0_i32 = arith.constant 0 : i32
    %c8_i32 = arith.constant 8 : i32
    %0 = arith.addi %c0_i32, %c8_i32 : i32
    %c1_i32 = arith.constant 1 : i32
    scf.for %arg12 = %c0_i32 to %0 step %c1_i32  : i32 {
      %c1_i32_26 = arith.constant 1 : i32
      %39 = arith.muli %arg12, %c1_i32_26 : i32
      %c0_i32_27 = arith.constant 0 : i32
      %40 = arith.addi %c0_i32_27, %39 : i32
      %41 = arith.index_cast %40 : i32 to index
      %c0_28 = arith.constant 0 : index
      %c0_29 = arith.constant 0 : index
      %42 = vector.load %arg1[%41, %c0_28, %c0_29] : memref<8x8x128xbf16, #tpu.memory_space<vmem>>, vector<1x8x128xbf16>
      %43 = vector.shape_cast %42 : vector<1x8x128xbf16> to vector<8x128xbf16>
      %44 = arith.extf %43 : vector<8x128xbf16> to vector<8x128xf32>
      %45 = tpu.transpose %44, [1, 0] : vector<8x128xf32> -> vector<128x8xf32>
      %46 = arith.truncf %45 : vector<128x8xf32> to vector<128x8xbf16>
      %c0_30 = arith.constant 0 : index
      %c0_31 = arith.constant 0 : index
      %47 = vector.load %arg2[%c0_30, %c0_31] : memref<8x128xbf16, #tpu.memory_space<vmem>>, vector<8x128xbf16>
      %cst_32 = arith.constant dense<0.000000e+00> : vector<128x128xf32>
      %48 = tpu.matmul %46, %47, %cst_32 {dimension_numbers = #tpu.dot_dimension_numbers<[1], [0], [0], [1], [0, 0, 1, 1], [], []>} : vector<128x8xbf16>, vector<8x128xbf16>, vector<128x128xf32> -> vector<128x128xf32>
      %cst_33 = arith.constant dense<0xFF800000> : vector<128xf32>
      %49 = vector.multi_reduction <maximumf>, %48, %cst_33 [0] : vector<128x128xf32> to vector<128xf32>
      %50 = vector.shape_cast %49 : vector<128xf32> to vector<1x128xf32>
      %51 = arith.index_cast %40 : i32 to index
      %c0_34 = arith.constant 0 : index
      %52 = vector.load %arg11[%51, %c0_34] : memref<8x128xf32, #tpu.memory_space<vmem>>, vector<1x128xf32>
      tpu.vector_store %arg11[%51, %c0_34], %50 {strides = array<i32>} : memref<8x128xf32, #tpu.memory_space<vmem>>, vector<1x128xf32>,
    }
    %c8_i32_0 = arith.constant 8 : i32
    %c0 = arith.constant 0 : index
    %c0_1 = arith.constant 0 : index
    %1 = vector.load %arg11[%c0, %c0_1] : memref<8x128xf32, #tpu.memory_space<vmem>>, vector<8x128xf32>
    %c0_2 = arith.constant 0 : index
    %c0_3 = arith.constant 0 : index
    %2 = vector.load %arg3[%c0_2, %c0_3] : memref<1x128xf32, #tpu.memory_space<vmem>>, vector<1x128xf32>
    %3 = vector.broadcast %2 : vector<1x128xf32> to vector<8x128xf32>
    %4 = arith.addf %1, %3 : vector<8x128xf32>
    %cst = arith.constant 0.000000e+00 : f32
    %5 = vector.broadcast %cst : f32 to vector<8x128xf32>
    %6 = arith.cmpf ogt, %4, %5 : vector<8x128xf32>
    %cst_4 = arith.constant 0.00999999977 : f32
    %7 = vector.broadcast %cst_4 : f32 to vector<8x128xf32>
    %8 = arith.mulf %7, %4 : vector<8x128xf32>
    %9 = arith.select %6, %4, %8 : vector<8x128xi1>, vector<8x128xf32>
    %10 = arith.truncf %9 : vector<8x128xf32> to vector<8x128xbf16>
    %c0_5 = arith.constant 0 : index
    %c0_6 = arith.constant 0 : index
    %11 = vector.load %arg4[%c0_5, %c0_6] : memref<128x512xbf16, #tpu.memory_space<vmem>>, vector<128x512xbf16>
    %cst_7 = arith.constant dense<0.000000e+00> : vector<8x512xf32>
    %12 = tpu.matmul %10, %11, %cst_7 {dimension_numbers = #tpu.dot_dimension_numbers<[1], [0], [0], [1], [0, 0, 1, 1], [], []>} : vector<8x128xbf16>, vector<128x512xbf16>, vector<8x512xf32> -> vector<8x512xf32>
    %c0_8 = arith.constant 0 : index
    %c0_9 = arith.constant 0 : index
    %13 = vector.load %arg5[%c0_8, %c0_9] : memref<1x512xf32, #tpu.memory_space<vmem>>, vector<1x512xf32>
    %14 = vector.broadcast %13 : vector<1x512xf32> to vector<8x512xf32>
    %15 = arith.addf %12, %14 : vector<8x512xf32>
    %cst_10 = arith.constant 0.000000e+00 : f32
    %16 = vector.broadcast %cst_10 : f32 to vector<8x512xf32>
    %17 = arith.cmpf ogt, %15, %16 : vector<8x512xf32>
    %cst_11 = arith.constant 0.00999999977 : f32
    %18 = vector.broadcast %cst_11 : f32 to vector<8x512xf32>
    %19 = arith.mulf %18, %15 : vector<8x512xf32>
    %20 = arith.select %17, %15, %19 : vector<8x512xi1>, vector<8x512xf32>
    %21 = arith.truncf %20 : vector<8x512xf32> to vector<8x512xbf16>
    %c0_12 = arith.constant 0 : index
    %c0_13 = arith.constant 0 : index
    %22 = vector.load %arg6[%c0_12, %c0_13] : memref<512x256xbf16, #tpu.memory_space<vmem>>, vector<512x256xbf16>
    %cst_14 = arith.constant dense<0.000000e+00> : vector<8x256xf32>
    %23 = tpu.matmul %21, %22, %cst_14 {dimension_numbers = #tpu.dot_dimension_numbers<[1], [0], [0], [1], [0, 0, 1, 1], [], []>} : vector<8x512xbf16>, vector<512x256xbf16>, vector<8x256xf32> -> vector<8x256xf32>
    %c0_15 = arith.constant 0 : index
    %c0_16 = arith.constant 0 : index
    %24 = vector.load %arg7[%c0_15, %c0_16] : memref<1x256xf32, #tpu.memory_space<vmem>>, vector<1x256xf32>
    %25 = vector.broadcast %24 : vector<1x256xf32> to vector<8x256xf32>
    %26 = arith.addf %23, %25 : vector<8x256xf32>
    %cst_17 = arith.constant 0.000000e+00 : f32
    %27 = vector.broadcast %cst_17 : f32 to vector<8x256xf32>
    %28 = arith.cmpf ogt, %26, %27 : vector<8x256xf32>
    %cst_18 = arith.constant 0.00999999977 : f32
    %29 = vector.broadcast %cst_18 : f32 to vector<8x256xf32>
    %30 = arith.mulf %29, %26 : vector<8x256xf32>
    %31 = arith.select %28, %26, %30 : vector<8x256xi1>, vector<8x256xf32>
    %32 = arith.truncf %31 : vector<8x256xf32> to vector<8x256xbf16>
    %c0_19 = arith.constant 0 : index
    %c0_20 = arith.constant 0 : index
    %33 = vector.load %arg8[%c0_19, %c0_20] : memref<256x128xbf16, #tpu.memory_space<vmem>>, vector<256x128xbf16>
    %cst_21 = arith.constant dense<0.000000e+00> : vector<8x128xf32>
    %34 = tpu.matmul %32, %33, %cst_21 {dimension_numbers = #tpu.dot_dimension_numbers<[1], [0], [0], [1], [0, 0, 1, 1], [], []>} : vector<8x256xbf16>, vector<256x128xbf16>, vector<8x128xf32> -> vector<8x128xf32>
    %c0_22 = arith.constant 0 : index
    %c0_23 = arith.constant 0 : index
    %35 = vector.load %arg9[%c0_22, %c0_23] : memref<1x128xf32, #tpu.memory_space<vmem>>, vector<1x128xf32>
    %36 = vector.broadcast %35 : vector<1x128xf32> to vector<8x128xf32>
    %37 = arith.addf %34, %36 : vector<8x128xf32>
    %c0_24 = arith.constant 0 : index
    %c0_25 = arith.constant 0 : index
    %38 = vector.load %arg10[%c0_24, %c0_25] : memref<8x128xf32, #tpu.memory_space<vmem>>, vector<8x128xf32>
    tpu.vector_store %arg10[%c0_24, %c0_25], %37 {strides = array<i32>} : memref<8x128xf32, #tpu.memory_space<vmem>>, vector<8x128xf32>,
    return
  }
  func.func @transform_0(%arg0: i32) -> (i32, i32, i32) {
    %c0_i32 = arith.constant 0 : i32
    %c0_i32_0 = arith.constant 0 : i32
    %c0_i32_1 = arith.constant 0 : i32
    return %arg0, %c0_i32, %c0_i32_0 : i32, i32, i32
  }
  func.func @transform_1(%arg0: i32) -> (i32, i32) {
    %c0_i32 = arith.constant 0 : i32
    %c0_i32_0 = arith.constant 0 : i32
    %c0_i32_1 = arith.constant 0 : i32
    return %c0_i32, %c0_i32_0 : i32, i32
  }
  func.func @transform_2(%arg0: i32) -> (i32, i32) {
    %c0_i32 = arith.constant 0 : i32
    %c0_i32_0 = arith.constant 0 : i32
    %c0_i32_1 = arith.constant 0 : i32
    return %c0_i32, %c0_i32_0 : i32, i32
  }
  func.func @transform_3(%arg0: i32) -> (i32, i32) {
    %c0_i32 = arith.constant 0 : i32
    %c0_i32_0 = arith.constant 0 : i32
    %c0_i32_1 = arith.constant 0 : i32
    return %c0_i32, %c0_i32_0 : i32, i32
  }
  func.func @transform_4(%arg0: i32) -> (i32, i32) {
    %c0_i32 = arith.constant 0 : i32
    %c0_i32_0 = arith.constant 0 : i32
    %c0_i32_1 = arith.constant 0 : i32
    return %c0_i32, %c0_i32_0 : i32, i32
  }
  func.func @transform_5(%arg0: i32) -> (i32, i32) {
    %c0_i32 = arith.constant 0 : i32
    %c0_i32_0 = arith.constant 0 : i32
    %c0_i32_1 = arith.constant 0 : i32
    return %c0_i32, %c0_i32_0 : i32, i32
  }
  func.func @transform_6(%arg0: i32) -> (i32, i32) {
    %c0_i32 = arith.constant 0 : i32
    %c0_i32_0 = arith.constant 0 : i32
    %c0_i32_1 = arith.constant 0 : i32
    return %c0_i32, %c0_i32_0 : i32, i32
  }
  func.func @transform_7(%arg0: i32) -> (i32, i32) {
    %c0_i32 = arith.constant 0 : i32
    %c0_i32_0 = arith.constant 0 : i32
    %c0_i32_1 = arith.constant 0 : i32
    return %c0_i32, %c0_i32_0 : i32, i32
  }
  func.func @transform_8(%arg0: i32) -> (i32, i32) {
    %c0_i32 = arith.constant 0 : i32
    %c0_i32_0 = arith.constant 0 : i32
    %c0_i32_1 = arith.constant 0 : i32
    return %c0_i32, %c0_i32_0 : i32, i32
  }
  func.func @transform_9(%arg0: i32) -> (i32, i32) {
    %c0_i32 = arith.constant 0 : i32
    %c0_i32_0 = arith.constant 0 : i32
    return %arg0, %c0_i32 : i32, i32
  }
}

</mosaic_0001>

<bundles_post_ra>
// kernel: tpu_custom_call.1
= control target key start
LH: loop header
LB: loop body
LE: loop exit
PB: predicated region body
PF: predicated region fallthrough
CT: control target
= control target key end

     0   :  { %14 = vsyncpa [#allocation4], 0  ;;  %s2138_s0 = inlined_call_operand.hbm [shape: bf16[8,8,128], index: 0, kind: input, shape index: {}]   ;;  %s2139_s1 = inlined_call_operand.hbm [shape: bf16[8,128], index: 1, kind: input, shape index: {}]   ;;  %s2140_s2 = inlined_call_operand.vmem [shape: f32[1,128], index: 2, kind: input, shape index: {}]   ;;  %s2141_s3 = inlined_call_operand.hbm [shape: bf16[128,512], index: 3, kind: input, shape index: {}]   ;;  %s2142_s4 = inlined_call_operand.hbm [shape: f32[1,512], index: 4, kind: input, shape index: {}]   ;;  %s2143_s5 = inlined_call_operand.hbm [shape: bf16[512,256], index: 5, kind: input, shape index: {}]   ;;  %s2144_s6 = inlined_call_operand.vmem [shape: f32[1,256], index: 6, kind: input, shape index: {}]   ;;  %s2145_s7 = inlined_call_operand.hbm [shape: bf16[256,128], index: 7, kind: input, shape index: {}]   ;;  %s2146_s8 = inlined_call_operand.vmem [shape: f32[1,128], index: 8, kind: input, shape index: {}]   ;;  %s2147_s9 = inlined_call_operand.hbm [shape: f32[8,128], index: 9, kind: output, shape index: {}]  }
   0x1   :  { %15 = vsyncpa [#allocation7], 0 }
   0x2   :  { %16 = vsyncpa [#allocation10], 0 }
   0x3   :  { %17 = vsyncpa [#allocation13], 0  ;;  %s37_s11 = sshll.u32 %s2139_s1, 4  ;;  %s38_s11 = int_to_ptr.hbm [resolvable:$true] %s37_s11 }
   0x4   :  { %18 = vsyncpa [#allocation5], 0  ;;  %s2027_s12 = smov [#allocation6]   ;;  %s63_s16 = sshll.u32 %s2142_s4, 4  ;;  %s64_s16 = int_to_ptr.hbm [resolvable:$true] %s63_s16 }
   0x5   :  { %s39_s13 = sshll.u32 %s2027_s12, 4  ;;  %s2028_s17 = smov [#allocation9]   ;;  %s40_s13 = int_to_ptr.vmem [resolvable:$true] %s39_s13 }
   0x6   :  { %42 = dma.hbm_to_vmem [thread:$0]  %s38_s11, 64, %s40_s13, [#allocation7]  }
   0x7   :  { %s65_s18 = sshll.u32 %s2028_s17, 4  ;;  %s23_s21 = sshll.u32 %s2138_s0, 4  ;;  %s66_s18 = int_to_ptr.vmem [resolvable:$true] %s65_s18  ;;  %s24_s21 = int_to_ptr.hbm [resolvable:$true] %s23_s21 }
   0x8   :  { %68 = dma.hbm_to_vmem [thread:$0]  %s64_s16, 64, %s66_s18, [#allocation10]  }
   0x9   :  { %s2029_s1 = smov [#allocation3]   ;;  %s49_s25 = sshll.u32 %s2141_s3, 4  ;;  %s50_s25 = int_to_ptr.hbm [resolvable:$true] %s49_s25 }
   0xa   :  { %s25_s22 = sshll.u32 %s2029_s1, 4  ;;  %s2030_s26 = smov 64   ;;  %s26_s22 = int_to_ptr.vmem [resolvable:$true] %s25_s22 }
   0xb   :  { %s2031_s4 = smov 4   ;;  %s2032_s27 = smov [#allocation8]  }
   0xc   :  { %31 = dma.hbm_to_vmem [thread:$0]  %s24_s21, 512, %s26_s22, [#allocation4], %s2030_s26, %s2030_s26, %s2031_s4  }
   0xd   :  { %s51_s28 = sshll.u32 %s2032_s27, 4  ;;  %s2033_s29 = smov 256   ;;  %s52_s28 = int_to_ptr.vmem [resolvable:$true] %s51_s28 }
   0xe   :  { %s2034_s30 = smov 16   ;;  %s73_s11 = sshll.u32 %s2143_s5, 4  ;;  %s74_s11 = int_to_ptr.hbm [resolvable:$true] %s73_s11 }
   0xf   :  { %57 = dma.hbm_to_vmem [thread:$0]  %s50_s25, 4096, %s52_s28, [#allocation7], %s2033_s29, %s2033_s29, %s2034_s30  }
  0x10   :  { %s2035_s12 = smov [#allocation11]   ;;  %s88_s15 = sshll.u32 %s2145_s7, 4  ;;  %s89_s15 = int_to_ptr.hbm [resolvable:$true] %s88_s15 }
  0x11   :  { %s75_s13 = sshll.u32 %s2035_s12, 4  ;;  %s2036_s16 = smov 128   ;;  %s76_s13 = int_to_ptr.vmem [resolvable:$true] %s75_s13 }
  0x12   :  { %s2037_s17 = smov 8   ;;  %s2038_s18 = smov [#allocation12]  }
  0x13   :  { %81 = dma.hbm_to_vmem [thread:$0]  %s74_s11, 8192, %s76_s13, [#allocation10], %s2036_s16, %s2036_s16, %s2037_s17  }
  0x14   :  { %s90_s19 = sshll.u32 %s2038_s18, 4  ;;  %s91_s19 = int_to_ptr.vmem [resolvable:$true] %s90_s19 }
  0x15   :  { %96 = dma.hbm_to_vmem [thread:$0]  %s89_s15, 2048, %s91_s19, [#allocation13], %s2030_s26, %s2030_s26, %s2031_s4  }
  0x16   :  { %2013 = dma.done.wait [#allocation4], 512  }
  0x17   :  { %2014 = vsyncadd [#allocation4], 4294966784 }
  0x18   :  { %2015 = dma.done.wait [#allocation7], 4160  }
  0x19   :  { %2016 = vsyncadd [#allocation7], 4294963136 }
  0x1a   :  { %2017 = dma.done.wait [#allocation10], 8256  }
  0x1b   :  { %2018 = vsyncadd [#allocation10], 4294959040 }
  0x1c   :  { %2019 = dma.done.wait [#allocation13], 2048  }
  0x1d   :  { %2020 = vsyncadd [#allocation13], 4294965248  ;;  %s2108_s5 = smov 0  }
  0x1e LB: > { %s1245_s7 = sshll.u32 %s2025_s5, 2  ;;  %v174_v2 = vld [vmem:[#allocation6] sm:$0xf]  ;;  %vm200_vm0 = vcmask 1043456   ;;  %vm175_vm1 = vcmask 64512   ;;  %s274_s21 = scalar_lea.vmem [#allocation2], %s2025_s5  ;;  %s2025_s5 = sphi %s2108_s5, %s129_s5  }
  0x1f   : > { %s131_s20 = scalar_lea.vmem [#allocation3], %s1245_s7  ;;  %v202_v3 = vsel %vm200_vm0, %v174_v2, 0  ;;  %s129_s5 = sadd.s32 1, %s2025_s5  }
  0x20   : > { %v132_v0 = vld [vmem:[%s131_s20] sm:$0xf]  ;;  %211 = vmatpush.bf16.msra.mxu0 %v202_v3  ;;  %1814 = vmatpush.bf16.msra.mxu1 %v202_v3  ;;  %p126_p0 = scmp.ge.s32.totalorder %s129_s5, 8  }
  0x21   : > { %v133_v1 = vunpack.c.l.bf16 %v132_v0  ;;  %1815 = vmatpush.bf16.msra.mxu2 %v202_v3  ;;  %1816 = vmatpush.bf16.msra.mxu3 %v202_v3  ;;  %v1732_v2 = vld [vmem:[#allocation8 + $0xec] sm:$0xf0] (%p126_p0)  ;;  %v1730_v3 = vld [vmem:[#allocation8 + $0xe4] sm:$0xf] (%p126_p0)  ;;  %s2039_s25 = smov (%p126_p0), [#allocation14]   ;;  %s1224_s28 = sshll.u32 (%p126_p0), %s2147_s9, 4  ;;  %s1225_s28 = int_to_ptr.hbm [resolvable:$true] %s1224_s28 }
  0x22   :  { %s1222_s26 = sshll.u32 (%p126_p0), %s2039_s25, 4  ;;  %s1223_s26 = int_to_ptr.vmem [resolvable:$true] %s1222_s26 }
  0x23   : > { %134 = vxpose.xlu0.b32.start.end [1/1] (short) %v133_v1, 128  ;;  %v1368_v1 = vld [vmem:[#allocation8 + $0xe0] sm:$0xf] (%p126_p0) }
  0xc7   : > { %v150_v4 = vpop.trf.xlu0 }
  0xcf   : > { %v151_v5 = vpop.trf.xlu0 }
  0xd0   : > { %v166_v6 = vpack.c.bf16 %v151_v5, %v150_v4  ;;  %v1369_v4 = vor.u32 (%p126_p0), %v1732_v2, %v1368_v1  ;;  %v1370_v5 = vld [vmem:[#allocation8 + $0xf0] sm:$0xf0] (%p126_p0)  ;;  %v1296_v1 = vld [vmem:[#allocation8 + $0x48] sm:$0xf] (%p126_p0)  ;;  %v1713_v2 = vld [vmem:[#allocation8 + $0x54] sm:$0xf0] (%p126_p0) }
  0xd2   : > { %1246 = vmatmul.msk.bf16.vlgmr.msra.gmra.mxu0 %vm175_vm1, %v166_v6  ;;  %v1376_v6 = vld [vmem:[#allocation8 + $0xe8] sm:$0xf] (%p126_p0) }
  0xd3   :  { %488 = vmatpush.bf16.msra.mxu0 (%p126_p0), %v1369_v4  ;;  %v1298_v4 = vld [vmem:[#allocation8 + $0x58] sm:$0xf0] (%p126_p0) }
  0xd7   : > { %v152_v7 = vpop.trf.xlu0 }
  0xdf   : > { %v153_v8 = vpop.trf.xlu0 }
  0xe0   : > { %v167_v9 = vpack.c.bf16 %v153_v8, %v152_v7  ;;  %v1733_v7 = vld [vmem:[#allocation8 + $0xf4] sm:$0xf0] (%p126_p0)  ;;  %v1373_v8 = vor.u32 (%p126_p0), %v1730_v3, %v1370_v5  ;;  %v1711_v3 = vld [vmem:[#allocation8 + $0x4c] sm:$0xf] (%p126_p0) }
  0xe2   : > { %1247 = vmatmul.msk.bf16.gmra.mxu0 %vm175_vm1, %v167_v9  ;;  %v1377_v9 = vor.u32 (%p126_p0), %v1733_v7, %v1376_v6  ;;  %v1272_v6 = vld [vmem:[#allocation8 + $0x20] sm:$0xf] (%p126_p0)  ;;  %v1708_v7 = vld [vmem:[#allocation8 + $0x2c] sm:$0xf0] (%p126_p0) }
  0xe7   : > { %v154_v10 = vpop.trf.xlu0 }
  0xef   : > { %v155_v11 = vpop.trf.xlu0 }
  0xf0   : > { %v168_v12 = vpack.c.bf16 %v155_v11, %v154_v10  ;;  %v1731_v10 = vld [vmem:[#allocation8 + $0xec] sm:$0xf] (%p126_p0)  ;;  %v1378_v11 = vld [vmem:[#allocation8 + $0xf8] sm:$0xf0] (%p126_p0) }
  0xf2   : > { %1248 = vmatmul.msk.bf16.vlgmr.msra.gmra.mxu1 %vm175_vm1, %v168_v12  ;;  %v1352_v12 = vld [vmem:[#allocation8 + $0xc0] sm:$0xf] (%p126_p0) }
  0xf3   :  { %501 = vmatpush.bf16.msra.mxu1 (%p126_p0), %v1373_v8 }
  0xf7   : > { %v156_v13 = vpop.trf.xlu0 }
  0xff   : > { %v157_v14 = vpop.trf.xlu0 }
 0x100   : > { %v169_v15 = vpack.c.bf16 %v157_v14, %v156_v13  ;;  %v1381_v13 = vor.u32 (%p126_p0), %v1731_v10, %v1378_v11  ;;  %v1728_v14 = vld [vmem:[#allocation8 + $0xcc] sm:$0xf0] (%p126_p0)  ;;  %v1706_v10 = vld [vmem:[#allocation8 + $0x24] sm:$0xf] (%p126_p0)  ;;  %v1274_v11 = vld [vmem:[#allocation8 + $0x30] sm:$0xf0] (%p126_p0) }
 0x102   : > { %1249 = vmatmul.msk.bf16.gmra.mxu1 %vm175_vm1, %v169_v15  ;;  %v1726_v15 = vld [vmem:[#allocation8 + $0xc4] sm:$0xf] (%p126_p0) }
 0x107   : > { %v158_v16 = vpop.trf.xlu0 }
 0x10f   : > { %v159_v17 = vpop.trf.xlu0 }
 0x110   : > { %v170_v18 = vpack.c.bf16 %v159_v17, %v158_v16  ;;  %v1354_v16 = vld [vmem:[#allocation8 + $0xd0] sm:$0xf0] (%p126_p0)  ;;  %v1353_v17 = vor.u32 (%p126_p0), %v1728_v14, %v1352_v12  ;;  %v1280_v12 = vld [vmem:[#allocation8 + $0x28] sm:$0xf] (%p126_p0)  ;;  %v1709_v14 = vld [vmem:[#allocation8 + $0x34] sm:$0xf0] (%p126_p0) }
 0x112   : > { %1250 = vmatmul.msk.bf16.vlgmr.msra.gmra.mxu2 %vm175_vm1, %v170_v18  ;;  %v1357_v18 = vor.u32 (%p126_p0), %v1726_v15, %v1354_v16  ;;  %489 = vmatpush.bf16.msra.mxu0 (%p126_p0), %v1353_v17  ;;  %v1707_v16 = vld [vmem:[#allocation8 + $0x2c] sm:$0xf] (%p126_p0)  ;;  %v1282_v17 = vld [vmem:[#allocation8 + $0x38] sm:$0xf0] (%p126_p0) }
 0x113   :  { %514 = vmatpush.bf16.msra.mxu2 (%p126_p0), %v1377_v9  ;;  %v1297_v9 = vor.u32 (%p126_p0), %v1713_v2, %v1296_v1 }
 0x114   :  { %502 = vmatpush.bf16.msra.mxu1 (%p126_p0), %v1357_v18  ;;  %v1839_v18 = vld [vmem:[%s2140_s2] ss:$0 sm:$0xff] (%p126_p0) }
 0x117   : > { %v160_v19 = vpop.trf.xlu0 }
 0x11f   : > { %v161_v20 = vpop.trf.xlu0 }
 0x120   : > { %v171_v21 = vpack.c.bf16 %v161_v20, %v160_v19  ;;  %v1360_v19 = vld [vmem:[#allocation8 + $0xc8] sm:$0xf] (%p126_p0)  ;;  %v1729_v20 = vld [vmem:[#allocation8 + $0xd4] sm:$0xf0] (%p126_p0) }
 0x122   : > { %1251 = vmatmul.msk.bf16.gmra.mxu2 %vm175_vm1, %v171_v21  ;;  %v1727_v21 = vld [vmem:[#allocation8 + $0xcc] sm:$0xf] (%p126_p0) }
 0x127   : > { %v162_v22 = vpop.trf.xlu0 }
 0x12f   : > { %v163_v23 = vpop.trf.xlu0 }
 0x130   : > { %v172_v24 = vpack.c.bf16 %v163_v23, %v162_v22  ;;  %v1361_v22 = vor.u32 (%p126_p0), %v1729_v20, %v1360_v19  ;;  %v1362_v23 = vld [vmem:[#allocation8 + $0xd8] sm:$0xf0] (%p126_p0)  ;;  %v1273_v19 = vor.u32 (%p126_p0), %v1708_v7, %v1272_v6  ;;  %v1256_v20 = vld [vmem:[#allocation8] sm:$0xf] (%p126_p0) }
 0x131   :  { %v1777_v6 = vld [vmem:[#allocation11 + $0x154] sm:$0xf0] (%p126_p0) }
 0x132   : > { %1252 = vmatmul.msk.bf16.vlgmr.msra.gmra.mxu3 %vm175_vm1, %v172_v24  ;;  %v1336_v24 = vld [vmem:[#allocation8 + $0xa0] sm:$0xf] (%p126_p0)  ;;  %515 = vmatpush.bf16.msra.mxu2 (%p126_p0), %v1361_v22  ;;  %v1702_v22 = vld [vmem:[#allocation8 + $0x4] sm:$0xf] (%p126_p0) }
 0x133   :  { %527 = vmatpush.bf16.msra.mxu3 (%p126_p0), %v1381_v13  ;;  %v1301_v13 = vor.u32 (%p126_p0), %v1711_v3, %v1298_v4  ;;  %v1416_v4 = vld [vmem:[#allocation11 + $0x40] sm:$0xf] (%p126_p0) }
 0x137   : > { %v164_v25 = vpop.trf.xlu0 }
 0x13f   : > { %v165_v26 = vpop.trf.xlu0 }
 0x140   : > { %v173_v27 = vpack.c.bf16 %v165_v26, %v164_v25  ;;  %v1724_v25 = vld [vmem:[#allocation8 + $0xac] sm:$0xf0] (%p126_p0)  ;;  %v1365_v26 = vor.u32 (%p126_p0), %v1727_v21, %v1362_v23  ;;  %v1277_v23 = vor.u32 (%p126_p0), %v1706_v10, %v1274_v11  ;;  %v1793_v10 = vld [vmem:[#allocation11 + $0x1d4] sm:$0xf0] (%p126_p0)  ;;  %v1480_v11 = vld [vmem:[#allocation11 + $0xc0] sm:$0xf] (%p126_p0) }
 0x141   :  { %v1704_v21 = vld [vmem:[#allocation8 + $0xc] sm:$0xf0] (%p126_p0) }
 0x142   : > { %1253 = vmatmul.msk.bf16.gmra.mxu3 %vm175_vm1, %v173_v27  ;;  %v1722_v27 = vld [vmem:[#allocation8 + $0xa4] sm:$0xf] (%p126_p0) }
 0x143   :  { %528 = vmatpush.bf16.msra.mxu3 (%p126_p0), %v1365_v26  ;;  %v1264_v26 = vld [vmem:[#allocation8 + $0x8] sm:$0xf] (%p126_p0) }
 0x14f   : > { %v213_v29 = vpop.f32.mrf.mxu0 }
 0x157   : > { %v215_v32 = vpop.f32.mrf.mxu0 }
 0x15f   : > { %v218_v37 = vpop.f32.mrf.mxu0 }
 0x167   : > { %v220_v42 = vpop.f32.mrf.mxu0 }
 0x16f   : > { %v223_v28 = vpop.f32.mrf.mxu1 }
 0x170   : > { %v253_v44 = vmax.f32 %v213_v29, %v223_v28  ;;  %v1338_v28 = vld [vmem:[#allocation8 + $0xb0] sm:$0xf0] (%p126_p0)  ;;  %v1344_v29 = vld [vmem:[#allocation8 + $0xa8] sm:$0xf] (%p126_p0) }
 0x177   : > { %v225_v31 = vpop.f32.mrf.mxu1 }
 0x178   : > { %v254_v41 = vmax.f32 %v215_v32, %v225_v31  ;;  %v1725_v31 = vld [vmem:[#allocation8 + $0xb4] sm:$0xf0] (%p126_p0)  ;;  %v1723_v32 = vld [vmem:[#allocation8 + $0xac] sm:$0xf] (%p126_p0) }
 0x17f   : > { %v228_v35 = vpop.f32.mrf.mxu1 }
 0x180   : > { %v255_v45 = vmax.f32 %v218_v37, %v228_v35  ;;  %v1345_v35 = vor.u32 (%p126_p0), %v1725_v31, %v1344_v29  ;;  %v1720_v37 = vld [vmem:[#allocation8 + $0x8c] sm:$0xf0] (%p126_p0)  ;;  %v1285_v29 = vor.u32 (%p126_p0), %v1707_v16, %v1282_v17  ;;  %v1266_v31 = vld [vmem:[#allocation8 + $0x18] sm:$0xf0] (%p126_p0)  ;;  %v1408_v16 = vld [vmem:[#allocation11 + $0x30] sm:$0xf] (%p126_p0) }
 0x181   :  { %v1544_v17 = vld [vmem:[#allocation11 + $0x140] sm:$0xf] (%p126_p0) }
 0x182   :  { %516 = vmatpush.bf16.msra.mxu2 (%p126_p0), %v1345_v35  ;;  %v1257_v35 = vor.u32 (%p126_p0), %v1704_v21, %v1256_v20  ;;  %v1741_v20 = vld [vmem:[#allocation11 + $0x34] sm:$0xf0] (%p126_p0)  ;;  %v1608_v21 = vld [vmem:[#allocation11 + $0x1c0] sm:$0xf] (%p126_p0) }
 0x187   : > { %v230_v40 = vpop.f32.mrf.mxu1 }
 0x188   : > { %v256_v46 = vmax.f32 %v220_v42, %v230_v40  ;;  %v1322_v40 = vld [vmem:[#allocation8 + $0x90] sm:$0xf0] (%p126_p0)  ;;  %v1721_v42 = vld [vmem:[#allocation8 + $0x94] sm:$0xf0] (%p126_p0) }
 0x195   : > { %v233_v30 = vpop.f32.mrf.mxu2 }
 0x196   : > { %v257_v48 = vmax.f32 %v253_v44, %v233_v30  ;;  %v1337_v30 = vor.u32 (%p126_p0), %v1724_v25, %v1336_v24  ;;  %v1330_v44 = vld [vmem:[#allocation8 + $0x98] sm:$0xf0] (%p126_p0)  ;;  %v1281_v24 = vor.u32 (%p126_p0), %v1709_v14, %v1280_v12  ;;  %v1258_v25 = vld [vmem:[#allocation8 + $0x10] sm:$0xf0] (%p126_p0)  ;;  %v1759_v12 = vld [vmem:[#allocation11 + $0xc4] sm:$0xf0] (%p126_p0) }
 0x198   :  { %490 = vmatpush.bf16.msra.mxu0 (%p126_p0), %v1337_v30  ;;  %v1703_v30 = vld [vmem:[#allocation8 + $0xc] sm:$0xf] (%p126_p0) }
 0x19d   : > { %v235_v33 = vpop.f32.mrf.mxu2 }
 0x19e   : > { %v258_v47 = vmax.f32 %v254_v41, %v235_v33  ;;  %v1346_v33 = vld [vmem:[#allocation8 + $0xb8] sm:$0xf0] (%p126_p0)  ;;  %v1328_v41 = vld [vmem:[#allocation8 + $0x88] sm:$0xf] (%p126_p0) }
 0x1a5   : > { %v238_v38 = vpop.f32.mrf.mxu2 }
 0x1a6   : > { %v259_v49 = vmax.f32 %v255_v45, %v238_v38  ;;  %v1718_v38 = vld [vmem:[#allocation8 + $0x84] sm:$0xf] (%p126_p0) }
 0x1ad   : > { %v240_v43 = vpop.f32.mrf.mxu2 }
 0x1ae   : > { %v260_v50 = vmax.f32 %v256_v46, %v240_v43  ;;  %v1719_v43 = vld [vmem:[#allocation8 + $0x8c] sm:$0xf] (%p126_p0)  ;;  %v1325_v46 = vor.u32 (%p126_p0), %v1718_v38, %v1322_v40  ;;  %v1261_v38 = vor.u32 (%p126_p0), %v1702_v22, %v1258_v25 }
 0x1af   :  { %v1791_v22 = vld [vmem:[#allocation11 + $0x1c4] sm:$0xf0] (%p126_p0) }
 0x1b5   : > { %v243_v34 = vpop.f32.mrf.mxu3 }
 0x1b6   : > { %v261_v53 = vmax.f32 %v257_v48, %v243_v34  ;;  %v1341_v34 = vor.u32 (%p126_p0), %v1722_v27, %v1338_v28  ;;  %v1304_v48 = vld [vmem:[#allocation8 + $0x60] sm:$0xf] (%p126_p0)  ;;  %v1705_v27 = vld [vmem:[#allocation8 + $0x14] sm:$0xf0] (%p126_p0) }
 0x1b8   :  { %503 = vmatpush.bf16.msra.mxu1 (%p126_p0), %v1341_v34  ;;  %v1749_v34 = vld [vmem:[#allocation11 + $0x74] sm:$0xf0] (%p126_p0) }
 0x1bc   :  { %504 = vmatpush.bf16.msra.mxu1 (%p126_p0), %v1325_v46 }
 0x1bd   : > { %v245_v36 = vpop.f32.mrf.mxu3 }
 0x1be   : > { %v262_v51 = vmax.f32 %v258_v47, %v245_v36  ;;  %v1320_v36 = vld [vmem:[#allocation8 + $0x80] sm:$0xf] (%p126_p0)  ;;  %v1329_v47 = vor.u32 (%p126_p0), %v1721_v42, %v1328_v41  ;;  %v1269_v41 = vor.u32 (%p126_p0), %v1703_v30, %v1266_v31  ;;  %v1773_v30 = vld [vmem:[#allocation11 + $0x134] sm:$0xf0] (%p126_p0) }
 0x1bf   :  { %v1321_v45 = vor.u32 (%p126_p0), %v1720_v37, %v1320_v36  ;;  %v1504_v36 = vld [vmem:[#allocation11 + $0xf0] sm:$0xf] (%p126_p0)  ;;  %v1765_v37 = vld [vmem:[#allocation11 + $0xf4] sm:$0xf0] (%p126_p0) }
 0x1c0   : > { %v265_v56 = vmax.f32 %v261_v53, %v262_v51  ;;  %v1333_v51 = vor.u32 (%p126_p0), %v1719_v43, %v1330_v44  ;;  %v1312_v53 = vld [vmem:[#allocation8 + $0x68] sm:$0xf] (%p126_p0)  ;;  %517 = vmatpush.bf16.msra.mxu2 (%p126_p0), %v1329_v47  ;;  %v1432_v43 = vld [vmem:[#allocation11 + $0x60] sm:$0xf] (%p126_p0)  ;;  %v1568_v44 = vld [vmem:[#allocation11 + $0x170] sm:$0xf] (%p126_p0)  ;;  %v1505_v47 = vor.u32 (%p126_p0), %v1765_v37, %v1504_v36 }
 0x1c1   :  { %491 = vmatpush.bf16.msra.mxu0 (%p126_p0), %v1321_v45  ;;  %v1781_v45 = vld [vmem:[#allocation11 + $0x174] sm:$0xf0] (%p126_p0)  ;;  %v1755_v36 = vld [vmem:[#allocation11 + $0xa4] sm:$0xf0] (%p126_p0) }
 0x1c5   : > { %v248_v39 = vpop.f32.mrf.mxu3 }
 0x1c6   : > { %v263_v54 = vmax.f32 %v259_v49, %v248_v39  ;;  %v1349_v39 = vor.u32 (%p126_p0), %v1723_v32, %v1346_v33  ;;  %v1716_v49 = vld [vmem:[#allocation8 + $0x6c] sm:$0xf0] (%p126_p0)  ;;  %v1440_v32 = vld [vmem:[#allocation11 + $0x70] sm:$0xf] (%p126_p0) }
 0x1c7   :  { %v1441_v42 = vor.u32 (%p126_p0), %v1749_v34, %v1440_v32  ;;  %v1739_v32 = vld [vmem:[#allocation11 + $0x24] sm:$0xf0] (%p126_p0)  ;;  %v1789_v34 = vld [vmem:[#allocation11 + $0x1b4] sm:$0xf0] (%p126_p0) }
 0x1c8   :  { %529 = vmatpush.bf16.msra.mxu3 (%p126_p0), %v1349_v39  ;;  %v1265_v39 = vor.u32 (%p126_p0), %v1705_v27, %v1264_v26  ;;  %v1409_v26 = vor.u32 (%p126_p0), %v1741_v20, %v1408_v16  ;;  %v1609_v27 = vor.u32 (%p126_p0), %v1791_v22, %v1608_v21  ;;  %v1634_v16 = vld [vmem:[#allocation11 + $0x1f8] sm:$0xf0] (%p126_p0) }
 0x1cc   :  { %530 = vmatpush.bf16.msra.mxu3 (%p126_p0), %v1333_v51  ;;  %v1496_v51 = vld [vmem:[#allocation11 + $0xe0] sm:$0xf] (%p126_p0) }
 0x1cd   : > { %v250_v52 = vpop.f32.mrf.mxu3 }
 0x1ce   : > { %v264_v55 = vmax.f32 %v260_v50, %v250_v52  ;;  %v1714_v50 = vld [vmem:[#allocation8 + $0x64] sm:$0xf] (%p126_p0)  ;;  %v1306_v52 = vld [vmem:[#allocation8 + $0x70] sm:$0xf0] (%p126_p0) }
 0x1d0   : > { %v266_v57 = vmax.f32 %v263_v54, %v264_v55  ;;  %v1717_v54 = vld [vmem:[#allocation8 + $0x74] sm:$0xf0] (%p126_p0)  ;;  %v1715_v55 = vld [vmem:[#allocation8 + $0x6c] sm:$0xf] (%p126_p0) }
 0x1d2   : > { %v267_v58 = vmax.f32 %v265_v56, %v266_v57  ;;  %v1314_v56 = vld [vmem:[#allocation8 + $0x78] sm:$0xf0] (%p126_p0)  ;;  %v1305_v57 = vor.u32 (%p126_p0), %v1716_v49, %v1304_v48  ;;  %v1747_v48 = vld [vmem:[#allocation11 + $0x64] sm:$0xf0] (%p126_p0)  ;;  %v1632_v49 = vld [vmem:[#allocation11 + $0x1f0] sm:$0xf] (%p126_p0) }
 0x1d4   : > { %v268_v59 = vrot.slane %v267_v58, 4  ;;  %492 = vmatpush.bf16.msra.mxu0 (%p126_p0), %v1305_v57  ;;  %v1560_v57 = vld [vmem:[#allocation11 + $0x160] sm:$0xf] (%p126_p0) }
 0x1d6   : > { %v269_v60 = vmax.f32 %v267_v58, %v268_v59  ;;  %v1309_v58 = vor.u32 (%p126_p0), %v1714_v50, %v1306_v52  ;;  %v1313_v59 = vor.u32 (%p126_p0), %v1717_v54, %v1312_v53  ;;  %v1797_v50 = vld [vmem:[#allocation11 + $0x1f4] sm:$0xf0] (%p126_p0)  ;;  %v1763_v52 = vld [vmem:[#allocation11 + $0xe4] sm:$0xf0] (%p126_p0)  ;;  %v1569_v53 = vor.u32 (%p126_p0), %v1781_v45, %v1568_v44  ;;  %v1592_v45 = vld [vmem:[#allocation11 + $0x1a0] sm:$0xf] (%p126_p0) }
 0x1d7   :  { %v1433_v54 = vor.u32 (%p126_p0), %v1747_v48, %v1432_v43  ;;  %v1737_v44 = vld [vmem:[#allocation11 + $0x14] sm:$0xf0] (%p126_p0) }
 0x1d8   : > { %v270_v61 = vrot.slane %v269_v60, 2  ;;  %505 = vmatpush.bf16.msra.mxu1 (%p126_p0), %v1309_v58  ;;  %518 = vmatpush.bf16.msra.mxu2 (%p126_p0), %v1313_v59  ;;  %v1779_v58 = vld [vmem:[#allocation11 + $0x164] sm:$0xf0] (%p126_p0)  ;;  %v1497_v59 = vor.u32 (%p126_p0), %v1763_v52, %v1496_v51  ;;  %v1753_v48 = vld [vmem:[#allocation11 + $0x94] sm:$0xf0] (%p126_p0) }
 0x1d9   :  { %v1561_v1 = vor.u32 (%p126_p0), %v1779_v58, %v1560_v57  ;;  %v1448_v57 = vld [vmem:[#allocation11 + $0x80] sm:$0xf] (%p126_p0)  ;;  %v1584_v58 = vld [vmem:[#allocation11 + $0x190] sm:$0xf] (%p126_p0) }
 0x1da   : > { %v271_v62 = vmax.f32 %v269_v60, %v270_v61  ;;  %v1288_v60 = vld [vmem:[#allocation8 + $0x40] sm:$0xf] (%p126_p0)  ;;  %v1712_v61 = vld [vmem:[#allocation8 + $0x4c] sm:$0xf0] (%p126_p0) }
 0x1db   :  { %v1289_v5 = vor.u32 (%p126_p0), %v1712_v61, %v1288_v60  ;;  %v1745_v60 = vld [vmem:[#allocation11 + $0x54] sm:$0xf0] (%p126_p0)  ;;  %v1624_v61 = vld [vmem:[#allocation11 + $0x1e0] sm:$0xf] (%p126_p0) }
 0x1dc   : > { %v272_v63 = vrot.slane %v271_v62, 1  ;;  %128 = sbr.rel (!%p126_p0) target bundleno = 30 (0x1e), region = 89  ;;  %519 = vmatpush.bf16.msra.mxu2 (%p126_p0), %v1297_v9  ;;  %v1616_v9 = vld [vmem:[#allocation11 + $0x1d0] sm:$0xf] (%p126_p0) }
 0x1dd   :  { %493 = vmatpush.bf16.msra.mxu0 (%p126_p0), %v1289_v5  ;;  %v1552_v5 = vld [vmem:[#allocation11 + $0x150] sm:$0xf] (%p126_p0) }
 0x1de   : > { %v273_v0 = vmax.f32 %v271_v62, %v272_v63  ;;  %v1710_v62 = vld [vmem:[#allocation8 + $0x44] sm:$0xf] (%p126_p0)  ;;  %v1317_v63 = vor.u32 (%p126_p0), %v1715_v55, %v1314_v56  ;;  %v1633_v55 = vor.u32 (%p126_p0), %v1797_v50, %v1632_v49  ;;  %v1424_v56 = vld [vmem:[#allocation11 + $0x50] sm:$0xf] (%p126_p0) }
 0x1df   :  { %v1425_v2 = vor.u32 (%p126_p0), %v1745_v60, %v1424_v56  ;;  %v1384_v50 = vld [vmem:[#allocation11] sm:$0xf] (%p126_p0)  ;;  %v1751_v60 = vld [vmem:[#allocation11 + $0x84] sm:$0xf0] (%p126_p0) }
 0x1e0   : > { %275 = vst [vmem:[%s274_s21] sm:$0x1] %v273_v0  ;;  %v1290_v0 = vld [vmem:[#allocation8 + $0x50] sm:$0xf0] (%p126_p0)  ;;  %531 = vmatpush.bf16.msra.mxu3 (%p126_p0), %v1317_v63  ;;  %520 = vmatpush.bf16.msra.mxu2 (%p126_p0), %v1281_v24  ;;  %v1757_v24 = vld [vmem:[#allocation11 + $0xb4] sm:$0xf0] (%p126_p0) }
 0x1e1   :  { %v1293_v8 = vor.u32 %v1710_v62, %v1290_v0  ;;  %494 = vmatpush.bf16.msra.mxu0 %v1273_v19  ;;  %v1795_v62 = vld [vmem:[#allocation11 + $0x1e4] sm:$0xf0]  ;;  %v1488_v63 = vld [vmem:[#allocation11 + $0xd0] sm:$0xf]  ;;  %v1761_v0 = vld [vmem:[#allocation11 + $0xd4] sm:$0xf0]  ;;  %v1481_v19 = vor.u32 %v1759_v12, %v1480_v11 }
 0x1e2   :  { %v1625_v3 = vor.u32 %v1795_v62, %v1624_v61  ;;  %v1489_v7 = vor.u32 %v1761_v0, %v1488_v63  ;;  %v1748_v61 = vld [vmem:[#allocation11 + $0x74] sm:$0xf]  ;;  %v1442_v62 = vld [vmem:[#allocation11 + $0x78] sm:$0xf0] }
 0x1e3   :  { %506 = vmatpush.bf16.msra.mxu1 %v1293_v8  ;;  %v1743_v8 = vld [vmem:[#allocation11 + $0x44] sm:$0xf0]  ;;  %v1764_v63 = vld [vmem:[#allocation11 + $0xf4] sm:$0xf]  ;;  %v1506_v0 = vld [vmem:[#allocation11 + $0xf8] sm:$0xf0] }
 0x1e4   :  { %532 = vmatpush.bf16.msra.mxu3 %v1301_v13  ;;  %521 = vmatpush.bf16.msra.mxu2 %v1265_v39  ;;  %v1553_v13 = vor.u32 %v1777_v6, %v1552_v5  ;;  %v1417_v14 = vor.u32 %v1743_v8, %v1416_v4  ;;  %v1746_v4 = vld [vmem:[#allocation11 + $0x64] sm:$0xf]  ;;  %v1512_v5 = vld [vmem:[#allocation11 + $0x100] sm:$0xf]  ;;  %v1767_v6 = vld [vmem:[#allocation11 + $0x104] sm:$0xf0]  ;;  %v1449_v8 = vor.u32 %v1751_v60, %v1448_v57 }
 0x1e5   :  { %495 = vmatpush.bf16.msra.mxu0 %v1257_v35  ;;  %v1464_v35 = vld [vmem:[#allocation11 + $0xa0] sm:$0xf]  ;;  %v1780_v11 = vld [vmem:[#allocation11 + $0x174] sm:$0xf]  ;;  %v1570_v12 = vld [vmem:[#allocation11 + $0x178] sm:$0xf0] }
 0x1e6   :  { %v1465_v43 = vor.u32 %v1755_v36, %v1464_v35  ;;  %v1573_v21 = vor.u32 %v1780_v11, %v1570_v12  ;;  %v1626_v35 = vld [vmem:[#allocation11 + $0x1e8] sm:$0xf0]  ;;  %v1790_v57 = vld [vmem:[#allocation11 + $0x1c4] sm:$0xf]  ;;  %v1752_v11 = vld [vmem:[#allocation11 + $0x94] sm:$0xf] }
 0x1e7   :  { %v276_v15 = vld [vmem:[#allocation2] sm:$0xff]  ;;  %507 = vmatpush.bf16.msra.mxu1 %v1277_v23  ;;  %v1738_v60 = vld [vmem:[#allocation11 + $0x24] sm:$0xf] }
 0x1e8   :  { %v281_v28 = vadd.f32 %v1839_v18, %v276_v15  ;;  %533 = vmatpush.bf16.msra.mxu3 %v1285_v29  ;;  %972 = vmatpush.bf16.msrb.mxu2 %v1569_v53  ;;  %v1617_v15 = vor.u32 %v1793_v10, %v1616_v9  ;;  %v1775_v18 = vld [vmem:[#allocation11 + $0x144] sm:$0xf0]  ;;  %v1472_v23 = vld [vmem:[#allocation11 + $0xb0] sm:$0xf]  ;;  %v1445_v9 = vor.u32 %v1748_v61, %v1442_v62  ;;  %v1402_v61 = vld [vmem:[#allocation11 + $0x28] sm:$0xf0] }
 0x1e9   :  { %946 = vmatpush.bf16.msrb.mxu0 %v1441_v42  ;;  %v1545_v25 = vor.u32 %v1775_v18, %v1544_v17  ;;  %v1536_v29 = vld [vmem:[#allocation11 + $0x130] sm:$0xf]  ;;  %v1473_v31 = vor.u32 %v1757_v24, %v1472_v23  ;;  %v1771_v42 = vld [vmem:[#allocation11 + $0x124] sm:$0xf0]  ;;  %v1762_v17 = vld [vmem:[#allocation11 + $0xe4] sm:$0xf] }
 0x1ea   :  { %vm282_vm2 = vcmp.gt.f32.partialorder %v281_v28, 0.0  ;;  %v283_v33 = vmul.f32 0.01, %v281_v28  ;;  %v1537_v37 = vor.u32 %v1773_v30, %v1536_v29  ;;  %v1735_v53 = vld [vmem:[#allocation11 + $0x4] sm:$0xf0] }
 0x1eb   :  { %508 = vmatpush.bf16.msra.mxu1 %v1261_v38  ;;  %v1783_v10 = vld [vmem:[#allocation11 + $0x184] sm:$0xf0]  ;;  %v1498_v18 = vld [vmem:[#allocation11 + $0xe8] sm:$0xf0]  ;;  %v1490_v29 = vld [vmem:[#allocation11 + $0xd8] sm:$0xf0] }
 0x1ec   :  { %v284_v40 = vsel %vm282_vm2, %v281_v28, %v283_v33  ;;  %534 = vmatpush.bf16.msra.mxu3 %v1269_v41  ;;  %973 = vmatpush.bf16.msrb.mxu2 %v1561_v1  ;;  %v1400_v28 = vld [vmem:[#allocation11 + $0x20] sm:$0xf]  ;;  %v1600_v33 = vld [vmem:[#allocation11 + $0x1b0] sm:$0xf]  ;;  %v1501_v24 = vor.u32 %v1762_v17, %v1498_v18  ;;  %v1786_v18 = vld [vmem:[#allocation11 + $0x1a4] sm:$0xf] }
 0x1ed   :  { %v285_v46 = vpack.c.bf16 %v284_v40, %v284_v40  ;;  %947 = vmatpush.bf16.msrb.mxu0 %v1433_v54  ;;  %v1401_v38 = vor.u32 %v1739_v32, %v1400_v28  ;;  %v1601_v39 = vor.u32 %v1789_v34, %v1600_v33  ;;  %v1392_v40 = vld [vmem:[#allocation11 + $0x10] sm:$0xf]  ;;  %v1528_v41 = vld [vmem:[#allocation11 + $0x120] sm:$0xf]  ;;  %v1562_v32 = vld [vmem:[#allocation11 + $0x168] sm:$0xf0] }
 0x1ee   :  { %v1529_v49 = vor.u32 %v1771_v42, %v1528_v41  ;;  %v1393_v51 = vor.u32 %v1737_v44, %v1392_v40  ;;  %v1520_v54 = vld [vmem:[#allocation11 + $0x110] sm:$0xf]  ;;  %v1794_v33 = vld [vmem:[#allocation11 + $0x1e4] sm:$0xf]  ;;  %v1482_v41 = vld [vmem:[#allocation11 + $0xc8] sm:$0xf0] }
 0x1ef   :  { %496 = vmatmul.bf16.vlgmr.msra.gmra.mxu0 %v285_v46  ;;  %959 = vmatpush.bf16.msrb.mxu1 %v1505_v47  ;;  %v1456_v47 = vld [vmem:[#allocation11 + $0x90] sm:$0xf]  ;;  %v1629_v36 = vor.u32 %v1794_v33, %v1626_v35  ;;  %v1554_v44 = vld [vmem:[#allocation11 + $0x158] sm:$0xf0]  ;;  %v1766_v33 = vld [vmem:[#allocation11 + $0x104] sm:$0xf] }
 0x1f0   :  { %509 = vmatmul.bf16.vlgmr.msra.gmra.mxu1 %v285_v46  ;;  %522 = vmatmul.bf16.vlgmr.msra.gmra.mxu2 %v285_v46  ;;  %v1457_v56 = vor.u32 %v1753_v48, %v1456_v47  ;;  %v1618_v47 = vld [vmem:[#allocation11 + $0x1d8] sm:$0xf0]  ;;  %v1782_v35 = vld [vmem:[#allocation11 + $0x184] sm:$0xf] }
 0x1f1   :  { %535 = vmatmul.bf16.vlgmr.msra.gmra.mxu3 %v285_v46  ;;  %948 = vmatpush.bf16.msrb.mxu0 %v1425_v2  ;;  %v1787_v46 = vld [vmem:[#allocation11 + $0x1a4] sm:$0xf0]  ;;  %v1385_v2 = vor.u32 %v1735_v53, %v1384_v50  ;;  %v1410_v50 = vld [vmem:[#allocation11 + $0x38] sm:$0xf0] }
 0x1f2   :  { %985 = vmatpush.bf16.msrb.mxu3 %v1633_v55  ;;  %974 = vmatpush.bf16.msrb.mxu2 %v1553_v13  ;;  %v1593_v52 = vor.u32 %v1787_v46, %v1592_v45  ;;  %v1769_v55 = vld [vmem:[#allocation11 + $0x114] sm:$0xf0]  ;;  %v1509_v13 = vor.u32 %v1764_v63, %v1506_v0  ;;  %v1792_v45 = vld [vmem:[#allocation11 + $0x1d4] sm:$0xf]  ;;  %v1474_v53 = vld [vmem:[#allocation11 + $0xb8] sm:$0xf0]  ;;  %v1405_v63 = vor.u32 %v1738_v60, %v1402_v61 }
 0x1f3   :  { %960 = vmatpush.bf16.msrb.mxu1 %v1497_v59  ;;  %v1785_v59 = vld [vmem:[#allocation11 + $0x194] sm:$0xf0]  ;;  %v1521_v1 = vor.u32 %v1769_v55, %v1520_v54  ;;  %v1621_v48 = vor.u32 %v1792_v45, %v1618_v47  ;;  %v1774_v55 = vld [vmem:[#allocation11 + $0x144] sm:$0xf]  ;;  %v1804_v61 = vld [vmem:[#allocation12 + $0x30] sm:$0xff] }
 0x1f4   :  { %v1754_v0 = vld [vmem:[#allocation11 + $0xa4] sm:$0xf] }
 0x1f5   :  { %949 = vmatpush.bf16.msrb.mxu0 %v1417_v14  ;;  %v1434_v14 = vld [vmem:[#allocation11 + $0x68] sm:$0xf0] }
 0x1f6   :  { %986 = vmatpush.bf16.msrb.mxu3 %v1625_v3  ;;  %975 = vmatpush.bf16.msrb.mxu2 %v1545_v25  ;;  %v1585_v3 = vor.u32 %v1785_v59, %v1584_v58  ;;  %v1437_v22 = vor.u32 %v1746_v4, %v1434_v14  ;;  %v1744_v25 = vld [vmem:[#allocation11 + $0x54] sm:$0xf]  ;;  %v1610_v59 = vld [vmem:[#allocation11 + $0x1c8] sm:$0xf0]  ;;  %v1538_v4 = vld [vmem:[#allocation11 + $0x138] sm:$0xf0] }
 0x1f7   :  { %961 = vmatpush.bf16.msrb.mxu1 %v1489_v7  ;;  %v1576_v7 = vld [vmem:[#allocation11 + $0x180] sm:$0xf]  ;;  %v1613_v62 = vor.u32 %v1790_v57, %v1610_v59  ;;  %v1770_v14 = vld [vmem:[#allocation11 + $0x124] sm:$0xf] }
 0x1f8   :  { %v1577_v20 = vor.u32 %v1783_v10, %v1576_v7  ;;  %v1602_v7 = vld [vmem:[#allocation11 + $0x1b8] sm:$0xf0] }
 0x1f9   :  { %950 = vmatpush.bf16.msrb.mxu0 %v1409_v26  ;;  %v1426_v26 = vld [vmem:[#allocation11 + $0x58] sm:$0xf0] }
 0x1fa   :  { %987 = vmatpush.bf16.msrb.mxu3 %v1617_v15  ;;  %976 = vmatpush.bf16.msrb.mxu2 %v1537_v37  ;;  %v1796_v15 = vld [vmem:[#allocation11 + $0x1f4] sm:$0xf]  ;;  %v1429_v28 = vor.u32 %v1744_v25, %v1426_v26  ;;  %v1742_v37 = vld [vmem:[#allocation11 + $0x44] sm:$0xf]  ;;  %v1394_v10 = vld [vmem:[#allocation11 + $0x18] sm:$0xf0] }
 0x1fb   :  { %962 = vmatpush.bf16.msrb.mxu1 %v1481_v19  ;;  %v1513_v19 = vor.u32 %v1767_v6, %v1512_v5  ;;  %v1637_v23 = vor.u32 %v1796_v15, %v1634_v16  ;;  %v1788_v5 = vld [vmem:[#allocation11 + $0x1b4] sm:$0xf]  ;;  %v1530_v15 = vld [vmem:[#allocation11 + $0x128] sm:$0xf0] }
 0x1fc   :  { %v1533_v17 = vor.u32 %v1770_v14, %v1530_v15  ;;  %v1798_v14 = vld [vmem:[#allocation12] sm:$0xff] }
 0x1fd   :  { %951 = vmatpush.bf16.msrb.mxu0 %v1401_v38  ;;  %v1418_v38 = vld [vmem:[#allocation11 + $0x48] sm:$0xf0]  ;;  %v1810_v15 = vld [vmem:[#allocation12 + $0x60] sm:$0xff] }
 0x1fe   :  { %988 = vmatpush.bf16.msrb.mxu3 %v1609_v27  ;;  %977 = vmatpush.bf16.msrb.mxu2 %v1529_v49  ;;  %v1760_v27 = vld [vmem:[#allocation11 + $0xd4] sm:$0xf]  ;;  %v1421_v40 = vor.u32 %v1742_v37, %v1418_v38  ;;  %v1578_v38 = vld [vmem:[#allocation11 + $0x188] sm:$0xf0] }
 0x1ff   :  { %963 = vmatpush.bf16.msrb.mxu1 %v1473_v31  ;;  %v1493_v30 = vor.u32 %v1760_v27, %v1490_v29  ;;  %v1778_v31 = vld [vmem:[#allocation11 + $0x164] sm:$0xf]  ;;  %v1740_v49 = vld [vmem:[#allocation11 + $0x34] sm:$0xf] }
 0x200   :  { %v1565_v34 = vor.u32 %v1778_v31, %v1562_v32  ;;  %v1768_v27 = vld [vmem:[#allocation11 + $0x114] sm:$0xf]  ;;  %v1586_v31 = vld [vmem:[#allocation11 + $0x198] sm:$0xf0] }
 0x201   :  { %952 = vmatpush.bf16.msrb.mxu0 %v1393_v51  ;;  %v1756_v51 = vld [vmem:[#allocation11 + $0xb4] sm:$0xf] }
 0x202   :  { %989 = vmatpush.bf16.msrb.mxu3 %v1601_v39  ;;  %978 = vmatpush.bf16.msrb.mxu2 %v1521_v1  ;;  %v1758_v39 = vld [vmem:[#allocation11 + $0xc4] sm:$0xf]  ;;  %v1477_v54 = vor.u32 %v1756_v51, %v1474_v53  ;;  %v1466_v1 = vld [vmem:[#allocation11 + $0xa8] sm:$0xf0]  ;;  %v1784_v29 = vld [vmem:[#allocation11 + $0x194] sm:$0xf] }
 0x203   :  { %964 = vmatpush.bf16.msrb.mxu1 %v1465_v43  ;;  %v1485_v42 = vor.u32 %v1758_v39, %v1482_v41  ;;  %v1776_v43 = vld [vmem:[#allocation11 + $0x154] sm:$0xf]  ;;  %v1589_v32 = vor.u32 %v1784_v29, %v1586_v31  ;;  %v1581_v39 = vor.u32 %v1782_v35, %v1578_v38  ;;  %v1805_v51 = vld [vmem:[#allocation12 + $0x38] sm:$0xff] }
 0x204   :  { %v1557_v46 = vor.u32 %v1776_v43, %v1554_v44 }
 0x205   :  { %953 = vmatpush.bf16.msrb.mxu0 %v1385_v2  ;;  %v1469_v2 = vor.u32 %v1754_v0, %v1466_v1 }
 0x206   :  { %990 = vmatpush.bf16.msrb.mxu3 %v1593_v52  ;;  %979 = vmatpush.bf16.msrb.mxu2 %v1513_v19  ;;  %v1413_v52 = vor.u32 %v1740_v49, %v1410_v50  ;;  %v1594_v19 = vld [vmem:[#allocation11 + $0x1a8] sm:$0xf0] }
 0x207   :  { %965 = vmatpush.bf16.msrb.mxu1 %v1457_v56  ;;  %v1546_v56 = vld [vmem:[#allocation11 + $0x148] sm:$0xf0] }
 0x208   :  { %v1549_v58 = vor.u32 %v1774_v55, %v1546_v56 }
 0x209   :  { %998 = vmatpush.bf16.msra.mxu0 %v1445_v9  ;;  %v1736_v9 = vld [vmem:[#allocation11 + $0x14] sm:$0xf] }
 0x20a   :  { %991 = vmatpush.bf16.msrb.mxu3 %v1585_v3  ;;  %1024 = vmatpush.bf16.msra.mxu2 %v1573_v21  ;;  %v1772_v3 = vld [vmem:[#allocation11 + $0x134] sm:$0xf]  ;;  %v1397_v12 = vor.u32 %v1736_v9, %v1394_v10  ;;  %v1597_v21 = vor.u32 %v1786_v18, %v1594_v19  ;;  %v1801_v9 = vld [vmem:[#allocation12 + $0x18] sm:$0xff]  ;;  %v1807_v18 = vld [vmem:[#allocation12 + $0x48] sm:$0xff] }
 0x20b   :  { %966 = vmatpush.bf16.msrb.mxu1 %v1449_v8  ;;  %v1541_v6 = vor.u32 %v1772_v3, %v1538_v4  ;;  %v1605_v8 = vor.u32 %v1788_v5, %v1602_v7  ;;  %v1803_v3 = vld [vmem:[#allocation12 + $0x28] sm:$0xff]  ;;  %v1802_v7 = vld [vmem:[#allocation12 + $0x20] sm:$0xff]  ;;  %v1800_v10 = vld [vmem:[#allocation12 + $0x10] sm:$0xff] }
 0x20d   :  { %999 = vmatpush.bf16.msra.mxu0 %v1437_v22  ;;  %v1386_v22 = vld [vmem:[#allocation11 + $0x8] sm:$0xf0] }
 0x20e   :  { %992 = vmatpush.bf16.msrb.mxu3 %v1577_v20  ;;  %1025 = vmatpush.bf16.msra.mxu2 %v1565_v34  ;;  %v1734_v20 = vld [vmem:[#allocation11 + $0x4] sm:$0xf]  ;;  %v1514_v34 = vld [vmem:[#allocation11 + $0x108] sm:$0xf0] }
 0x20f   :  { %1011 = vmatpush.bf16.msra.mxu1 %v1509_v13  ;;  %v1458_v13 = vld [vmem:[#allocation11 + $0x98] sm:$0xf0]  ;;  %v1389_v25 = vor.u32 %v1734_v20, %v1386_v22  ;;  %v1517_v37 = vor.u32 %v1766_v33, %v1514_v34  ;;  %v620_v20 = vld [vmem:[%s2144_s6] sm:$0x3]  ;;  %v1806_v22 = vld [vmem:[#allocation12 + $0x40] sm:$0xff] }
 0x210   :  { %v1461_v16 = vor.u32 %v1752_v11, %v1458_v13  ;;  %v1812_v11 = vld [vmem:[#allocation12 + $0x70] sm:$0xff]  ;;  %v1811_v13 = vld [vmem:[#allocation12 + $0x68] sm:$0xff] }
 0x211   :  { %1000 = vmatpush.bf16.msra.mxu0 %v1429_v28  ;;  %v1522_v28 = vld [vmem:[#allocation11 + $0x118] sm:$0xf0] }
 0x212   :  { %1037 = vmatpush.bf16.msra.mxu3 %v1637_v23  ;;  %1026 = vmatpush.bf16.msra.mxu2 %v1557_v46  ;;  %v1750_v23 = vld [vmem:[#allocation11 + $0x84] sm:$0xf] }
 0x213   :  { %1012 = vmatpush.bf16.msra.mxu1 %v1501_v24  ;;  %v1450_v24 = vld [vmem:[#allocation11 + $0x88] sm:$0xf0] }
 0x214   :  { %v1453_v26 = vor.u32 %v1750_v23, %v1450_v24  ;;  %v622_v23 = vperm.slane %v620_v20, 0 }
 0x215   :  { %1001 = vmatpush.bf16.msra.mxu0 %v1421_v40 }
 0x216   :  { %1038 = vmatpush.bf16.msra.mxu3 %v1629_v36  ;;  %1027 = vmatpush.bf16.msra.mxu2 %v1549_v58  ;;  %v318_v36 = vld [vmem:[#allocation9] sm:$0xf] }
 0x217   :  { %1013 = vmatpush.bf16.msra.mxu1 %v1493_v30  ;;  %v1525_v30 = vor.u32 %v1768_v27, %v1522_v28  ;;  %v320_v40 = vperm.slane %v318_v36, 0  ;;  %v321_v41 = vperm.slane %v318_v36, 1  ;;  %v323_v49 = vperm.slane %v318_v36, 3 }
 0x219   :  { %1002 = vmatpush.bf16.msra.mxu0 %v1413_v52 }
 0x21a   :  { %1039 = vmatpush.bf16.msra.mxu3 %v1621_v48  ;;  %1028 = vmatpush.bf16.msra.mxu2 %v1541_v6  ;;  %v322_v48 = vperm.slane %v318_v36, 2  ;;  %v623_v36 = vperm.slane %v620_v20, 1 }
 0x21b   :  { %1014 = vmatpush.bf16.msra.mxu1 %v1485_v42 }
 0x21d   :  { %1003 = vmatpush.bf16.msra.mxu0 %v1405_v63 }
 0x21e   :  { %1040 = vmatpush.bf16.msra.mxu3 %v1613_v62  ;;  %1029 = vmatpush.bf16.msra.mxu2 %v1533_v17  ;;  %v1808_v17 = vld [vmem:[#allocation12 + $0x50] sm:$0xff] }
 0x21f   :  { %1015 = vmatpush.bf16.msra.mxu1 %v1477_v54 }
 0x221   :  { %1004 = vmatpush.bf16.msra.mxu0 %v1397_v12  ;;  %v1799_v12 = vld [vmem:[#allocation12 + $0x8] sm:$0xff] }
 0x222   :  { %1041 = vmatpush.bf16.msra.mxu3 %v1605_v8  ;;  %1030 = vmatpush.bf16.msra.mxu2 %v1525_v30  ;;  %v1813_v8 = vld [vmem:[#allocation12 + $0x78] sm:$0xff] }
 0x223   :  { %1016 = vmatpush.bf16.msra.mxu1 %v1469_v2 }
 0x225   :  { %1005 = vmatpush.bf16.msra.mxu0 %v1389_v25 }
 0x226   :  { %1042 = vmatpush.bf16.msra.mxu3 %v1597_v21  ;;  %1031 = vmatpush.bf16.msra.mxu2 %v1517_v37 }
 0x227   :  { %1017 = vmatpush.bf16.msra.mxu1 %v1461_v16  ;;  %v1809_v16 = vld [vmem:[#allocation12 + $0x58] sm:$0xff] }
 0x22a   :  { %1043 = vmatpush.bf16.msra.mxu3 %v1589_v32 }
 0x22b   :  { %1018 = vmatpush.bf16.msra.mxu1 %v1453_v26 }
 0x22e   :  { %1044 = vmatpush.bf16.msra.mxu3 %v1581_v39 }
 0x26c   :  { %v497_v42 = vpop.f32.mrf.mxu0 }
 0x26d   :  { %v498_v43 = vadd.f32 %v497_v42, %v320_v40  ;;  %v510_v44 = vpop.f32.mrf.mxu1 }
 0x26e   :  { %v511_v45 = vadd.f32 %v510_v44, %v321_v41 }
 0x26f   :  { %vm540_vm3 = vcmp.gt.f32.partialorder %v498_v43, 0.0  ;;  %v544_v46 = vmul.f32 0.01, %v498_v43 }
 0x270   :  { %vm541_vm4 = vcmp.gt.f32.partialorder %v511_v45, 0.0  ;;  %v545_v47 = vmul.f32 0.01, %v511_v45 }
 0x271   :  { %v548_v50 = vsel %vm540_vm3, %v498_v43, %v544_v46 }
 0x272   :  { %v552_v52 = vpack.c.bf16 %v548_v50, %v548_v50  ;;  %v549_v53 = vsel %vm541_vm4, %v511_v45, %v545_v47 }
 0x273   :  { %v523_v54 = vpop.f32.mrf.mxu2  ;;  %v553_v55 = vpack.c.bf16 %v549_v53, %v549_v53 }
 0x274   :  { %v524_v56 = vadd.f32 %v523_v54, %v322_v48  ;;  %v536_v57 = vpop.f32.mrf.mxu3  ;;  %v499_v58 = vpop.f32.mrf.mxu0  ;;  %954 = vmatmul.bf16.vlgmr.msrb.gmra.mxu0 %v552_v52 }
 0x275   :  { %v537_v59 = vadd.f32 %v536_v57, %v323_v49  ;;  %967 = vmatmul.bf16.vlgmr.msrb.gmra.mxu1 %v553_v55  ;;  %v512_v60 = vpop.f32.mrf.mxu1  ;;  %1190 = vmatpush.bf16.msrb.mxu0 %v1805_v51 }
 0x276   :  { %vm542_vm5 = vcmp.gt.f32.partialorder %v524_v56, 0.0  ;;  %v546_v62 = vmul.f32 0.01, %v524_v56  ;;  %1203 = vmatpush.bf16.msrb.mxu1 %v1813_v8 }
 0x277   :  { %vm543_vm6 = vcmp.gt.f32.partialorder %v537_v59, 0.0  ;;  %v547_v63 = vmul.f32 0.01, %v537_v59 }
 0x278   :  { %v550_v0 = vsel %vm542_vm5, %v524_v56, %v546_v62 }
 0x279   :  { %v554_v1 = vpack.c.bf16 %v550_v0, %v550_v0  ;;  %v551_v2 = vsel %vm543_vm6, %v537_v59, %v547_v63  ;;  %1191 = vmatpush.bf16.msrb.mxu0 %v1804_v61 }
 0x27a   :  { %v555_v4 = vpack.c.bf16 %v551_v2, %v551_v2  ;;  %1204 = vmatpush.bf16.msrb.mxu1 %v1812_v11 }
 0x27b   :  { %v525_v5 = vpop.f32.mrf.mxu2  ;;  %980 = vmatmul.bf16.vlgmr.msrb.gmra.mxu2 %v554_v1 }
 0x27c   :  { %v538_v6 = vpop.f32.mrf.mxu3  ;;  %993 = vmatmul.bf16.vlgmr.msrb.gmra.mxu3 %v555_v4 }
 0x27d   :  { %1192 = vmatpush.bf16.msrb.mxu0 %v1803_v3 }
 0x27e   :  { %1205 = vmatpush.bf16.msrb.mxu1 %v1811_v13 }
 0x281   :  { %1193 = vmatpush.bf16.msrb.mxu0 %v1802_v7 }
 0x282   :  { %1206 = vmatpush.bf16.msrb.mxu1 %v1810_v15 }
 0x284   :  { %1006 = vmatmul.bf16.vlgmr.msra.gmra.mxu0 %v552_v52 }
 0x285   :  { %1019 = vmatmul.bf16.vlgmr.msra.gmra.mxu1 %v553_v55  ;;  %1194 = vmatpush.bf16.msrb.mxu0 %v1801_v9  ;;  %v1840_v55 = vld [vmem:[%s2146_s8] ss:$0 sm:$0xff] }
 0x286   :  { %1207 = vmatpush.bf16.msrb.mxu1 %v1809_v16 }
 0x289   :  { %1195 = vmatpush.bf16.msrb.mxu0 %v1800_v10 }
 0x28a   :  { %1208 = vmatpush.bf16.msrb.mxu1 %v1808_v17 }
 0x28b   :  { %1032 = vmatmul.bf16.vlgmr.msra.gmra.mxu2 %v554_v1 }
 0x28c   :  { %1045 = vmatmul.bf16.vlgmr.msra.gmra.mxu3 %v555_v4 }
 0x28d   :  { %1196 = vmatpush.bf16.msrb.mxu0 %v1799_v12 }
 0x28e   :  { %1209 = vmatpush.bf16.msrb.mxu1 %v1807_v18 }
 0x291   :  { %1197 = vmatpush.bf16.msrb.mxu0 %v1798_v14 }
 0x292   :  { %1210 = vmatpush.bf16.msrb.mxu1 %v1806_v22 }
 0x2f1   :  { %v955_v19 = vpop.f32.mrf.mxu0 }
 0x2f2   :  { %v968_v21 = vpop.f32.mrf.mxu1  ;;  %v956_v24 = vadd.f32 %v955_v19, %v622_v23 }
 0x2f4   :  { %v969_v27 = vadd.f32 %v968_v21, %v956_v24 }
 0x2f9   :  { %v957_v25 = vpop.f32.mrf.mxu0 }
 0x2fa   :  { %v970_v26 = vpop.f32.mrf.mxu1 }
 0x2fe   :  { %v981_v28 = vpop.f32.mrf.mxu2 }
 0x2ff   :  { %v982_v29 = vadd.f32 %v981_v28, %v969_v27  ;;  %v994_v30 = vpop.f32.mrf.mxu3 }
 0x301   :  { %v995_v31 = vadd.f32 %v994_v30, %v982_v29  ;;  %v1007_v32 = vpop.f32.mrf.mxu0 }
 0x302   :  { %v1020_v33 = vpop.f32.mrf.mxu1  ;;  %v1008_v40 = vadd.f32 %v1007_v32, %v623_v36 }
 0x303   :  { %vm1050_vm7 = vcmp.gt.f32.partialorder %v995_v31, 0.0  ;;  %v1052_v34 = vmul.f32 0.01, %v995_v31 }
 0x304   :  { %v1021_v43 = vadd.f32 %v1020_v33, %v1008_v40 }
 0x305   :  { %v1054_v35 = vsel %vm1050_vm7, %v995_v31, %v1052_v34 }
 0x306   :  { %v1056_v37 = vpack.c.bf16 %v1054_v35, %v1054_v35  ;;  %v983_v38 = vpop.f32.mrf.mxu2 }
 0x307   :  { %v996_v39 = vpop.f32.mrf.mxu3 }
 0x308   :  { %1198 = vmatmul.bf16.vlgmr.msrb.gmra.mxu0 %v1056_v37 }
 0x309   :  { %v1009_v41 = vpop.f32.mrf.mxu0 }
 0x30a   :  { %v1022_v42 = vpop.f32.mrf.mxu1 }
 0x30e   :  { %v1033_v44 = vpop.f32.mrf.mxu2 }
 0x30f   :  { %v1034_v45 = vadd.f32 %v1033_v44, %v1021_v43  ;;  %v1046_v46 = vpop.f32.mrf.mxu3 }
 0x311   :  { %v1047_v47 = vadd.f32 %v1046_v46, %v1034_v45 }
 0x313   :  { %vm1051_vm8 = vcmp.gt.f32.partialorder %v1047_v47, 0.0  ;;  %v1053_v48 = vmul.f32 0.01, %v1047_v47 }
 0x315   :  { %v1055_v49 = vsel %vm1051_vm8, %v1047_v47, %v1053_v48 }
 0x316   :  { %v1057_v50 = vpack.c.bf16 %v1055_v49, %v1055_v49  ;;  %v1035_v51 = vpop.f32.mrf.mxu2 }
 0x317   :  { %v1048_v52 = vpop.f32.mrf.mxu3 }
 0x318   :  { %1211 = vmatmul.bf16.vlgmr.msrb.gmra.mxu1 %v1057_v50 }
 0x385   :  { %v1199_v53 = vpop.f32.mrf.mxu0 }
 0x386   :  { %v1200_v56 = vadd.f32 %v1840_v55, %v1199_v53 }
 0x38d   :  { %v1201_v54 = vpop.f32.mrf.mxu0 }
 0x395   :  { %v1212_v57 = vpop.f32.mrf.mxu1 }
 0x396   :  { %v1213_v58 = vadd.f32 %v1212_v57, %v1200_v56 }
 0x398   :  { %1216 = vst [vmem:[#allocation14] sm:$0xff] %v1213_v58 }
 0x399   :  { %1227 = dma.vmem_to_hbm [thread:$0]  %s1223_s26, 128, %s1225_s28, [#allocation5]  }
 0x39d   :  { %v1214_v59 = vpop.f32.mrf.mxu1 }
 0x39e   :  { %2021 = dma.done.wait [#allocation5], 128  }
 0x39f   :  { %2022 = vsyncadd [#allocation5], 4294967168 }
 0x3a0   :  { %1232 = vsyncpa [#allocation4], 1 }
 0x3a1   :  { %1233 = vsyncpa [#allocation7], 1 }
 0x3a2   :  { %1234 = vsyncpa [#allocation10], 1 }
 0x3a3   :  { %1235 = vsyncpa [#allocation13], 1 }
 0x3a4   :  { %1236 = vsyncpa [#allocation5], 1 }

</bundles_post_ra>
